<compile_context>
chip_gen: v5e
topology: v5e:2x2
jax: 0.10.0
libtpu: 0.0.40
codegen_flags: <defaults>
</compile_context>

<pallas_src>
import functools
import math

import jax
import jax.numpy as jnp
from jax.experimental import pallas as pl
from jax.experimental.pallas import tpu as pltpu

EPS = 1e-5  # PyTorch LayerNorm default eps


# ----------------------------- Pallas kernel --------------------------------
def _dencoder_kernel(x_ref, wqkv_ref, bqkv_ref, wo_ref, bo_ref,
                     w1_ref, b1_ref, w2_ref, b2_ref, o_ref,
                     *, num_heads, dim_head, scale, tdt):
    H, Dh = num_heads, dim_head
    HD = H * Dh
    cdt = wqkv_ref.dtype                       # bf16 compute dtype for MXU inputs

    x = x_ref[0]                               # (T, D) float32
    T = x.shape[0]

    # ---- LayerNorm 1 (affine folded into wqkv / bqkv in the wrapper) ----
    mu = jnp.mean(x, axis=-1, keepdims=True)
    var = jnp.mean((x - mu) ** 2, axis=-1, keepdims=True)
    x1 = (x - mu) * jax.lax.rsqrt(var + EPS)

    # ---- fused QKV projection, produced already transposed: (3*H*Dh, T) ----
    # trans_b matmul against the pre-transposed (3*H*Dh, D) weight; avoids the
    # large (T, 3HDh) -> (3HDh, T) XLU transpose of the previous version.
    qkv = jax.lax.dot_general(wqkv_ref[...], x1.astype(cdt),
                              (((1,), (1,)), ((), ())),
                              preferred_element_type=jnp.float32) + bqkv_ref[...]

    # Head split is a leading-dim reshape (pure relabeling when Dh % 8 == 0).
    q_t = qkv[0:HD].reshape(H, Dh, T)            # (H, Dh, T)
    k_t = qkv[HD:2 * HD].reshape(H, Dh, T)       # (H, Dh, T)  kept transposed
    v_t = qkv[2 * HD:3 * HD].reshape(H, Dh, T)   # (H, Dh, T)  kept transposed
    q_h = jnp.swapaxes(q_t, 1, 2)                # (H, T, Dh)  the only transpose

    # ---- discriminator attention: pairwise L2 distances, head-batched ----
    sq = jnp.sum(q_h * q_h, axis=-1, keepdims=True)        # (H, T, 1) f32 stats
    sk = jnp.sum(k_t * k_t, axis=1, keepdims=True)         # (H, 1, T) f32 stats
    qk = jax.lax.dot_general(q_h.astype(cdt), k_t.astype(cdt),
                             (((2,), (1,)), ((0,), (0,))),
                             preferred_element_type=jnp.float32)   # (H, T, T)
    d2 = jnp.maximum(sq + sk - 2.0 * qk, 0.0)               # cdist^2, clamped

    # sqrt/exp on bf16 tiles where the EUP supports it (v6e/v7x); f32 elsewhere.
    s = jnp.sqrt(d2.astype(tdt)) * scale
    m = jnp.max(s, axis=-1, keepdims=True)                  # exact (no accumulation)
    p = jnp.exp(s - m)                                      # unnormalized probs
    l = jnp.sum(p, axis=-1, keepdims=True, dtype=jnp.float32)   # (H, T, 1) f32

    # Deferred normalization: contract P@V first, then scale the (H,T,Dh) context.
    ctx = jax.lax.dot_general(p.astype(cdt), v_t.astype(cdt),
                              (((2,), (2,)), ((0,), (0,))),
                              preferred_element_type=jnp.float32)  # (H, T, Dh)
    ctx = ctx * pl.reciprocal(l, approx=True)

    # 'b t (h d)' rearrange folded into W_out reshaped to (H, Dh, D):
    # batched per-head (T,Dh)@(Dh,D) then a cheap sum over heads.
    att_h = jax.lax.dot_general(ctx.astype(cdt), wo_ref[...],
                                (((2,), (1,)), ((0,), (0,))),
                                preferred_element_type=jnp.float32)  # (H, T, D)
    x = x + jnp.sum(att_h, axis=0) + bo_ref[...]            # residual (dropout == 0)

    # ---- LayerNorm 2 (affine folded into w1 / b1 in the wrapper) ----
    mu2 = jnp.mean(x, axis=-1, keepdims=True)
    var2 = jnp.mean((x - mu2) ** 2, axis=-1, keepdims=True)
    x2 = (x - mu2) * jax.lax.rsqrt(var2 + EPS)

    # ---- MLP (Linear -> exact GELU -> Linear), bf16 in / f32 accumulate ----
    h1 = jnp.dot(x2.astype(cdt), w1_ref[...],
                 preferred_element_type=jnp.float32) + b1_ref[...]
    # nn.GELU() default is exact erf; kept for fidelity.
    # TODO(synk): tanh-GELU would move most of this VPU polynomial onto the EUP.
    h1 = 0.5 * h1 * (1.0 + jax.lax.erf(h1 * (2.0 ** -0.5)))
    mlp = jnp.dot(h1.astype(cdt), w2_ref[...],
                  preferred_element_type=jnp.float32) + b2_ref[...]

    o_ref[0] = (x + mlp).astype(o_ref.dtype)


# ------------------------------ wrapper --------------------------------------
def _transcendental_dtype():
    # bf16 sqrt/exp roughly doubles EUP throughput on v6e/v7x; v5e and older
    # chips have no bf16 EUP/VPU, so keep f32 there.
    try:
        kind = jax.devices()[0].device_kind.lower()
    except Exception:
        return jnp.float32
    return jnp.bfloat16 if ("v6" in kind or "v7" in kind) else jnp.float32


def _vmem_limit_bytes(T, D, hid, H, Dh, weights, single_buffer, tdt):
    f32 = 4
    tb = jnp.dtype(tdt).itemsize
    HD = H * Dh
    w_bytes = (1 if single_buffer else 2) * sum(
        math.prod(w.shape) * w.dtype.itemsize for w in weights)
    io_bytes = 2 * 2 * T * D * f32                      # double-buffered x / out tiles
    inter = f32 * (3 * T * D                            # x1 / x2 / residual
                   + 3 * HD * T + HD * T                # qkv_t + q_h copy
                   + 2 * H * T * T                      # qk + d2
                   + 2 * H * T * Dh                     # ctx (+ scaled)
                   + H * T * D                          # per-head projected output
                   + 2 * T * hid + 2 * T * D)           # mlp hidden / gelu / out
    inter += tb * 3 * H * T * T                         # dist / shifted / probs
    est = w_bytes + io_bytes + inter + (4 << 20)        # + compiler scratch margin
    cap = 64 << 20                                      # conservative fallback (v7x)
    try:
        cap = pltpu.get_tpu_info().vmem_capacity_bytes
    except Exception:
        pass
    return int(min(max(est, 16 << 20), cap - (12 << 20)))


def dencoder_block(x, kparams, *, num_heads, dim_head):
    B, T, D = x.shape
    weights = tuple(kparams)
    hid = weights[4].shape[1]                            # w1 is (D, hid)
    tdt = _transcendental_dtype()
    kernel = functools.partial(_dencoder_kernel, num_heads=num_heads,
                               dim_head=dim_head, scale=float(D) ** (-0.5), tdt=tdt)

    # TODO(synk): for production T on v7x (64 MiB VMEM), flash-tile the sequence
    # (grid=(B, T//tq) both 'parallel' + online-softmax kv loop) so only (tq, T)
    # score tiles and (tq, 4D) MLP hidden are resident; whole-sequence per batch
    # element is fine at the toy shapes exercised here.
    def build(single_buffer_weights):
        in_specs = [pl.BlockSpec((1, T, D), lambda b: (b, 0, 0))]
        for w in weights:
            kw = {}
            if single_buffer_weights:
                # Constant index_map across the grid -> double-buffering the
                # resident weights is pure VMEM waste.
                kw["pipeline_mode"] = pl.Buffered(1)
            in_specs.append(pl.BlockSpec(w.shape, lambda b, n=w.ndim: (0,) * n, **kw))
        vmem_limit = _vmem_limit_bytes(T, D, hid, num_heads, dim_head, weights,
                                       single_buffer_weights, tdt)
        return pl.pallas_call(
            kernel,
            out_shape=jax.ShapeDtypeStruct((B, T, D), x.dtype),
            grid_spec=pltpu.PrefetchScalarGridSpec(
                num_scalar_prefetch=0,
                grid=(B,),
                in_specs=in_specs,
                out_specs=pl.BlockSpec((1, T, D), lambda b: (b, 0, 0)),
            ),
            compiler_params=pltpu.CompilerParams(
                dimension_semantics=("parallel",),
                vmem_limit_bytes=vmem_limit,
            ),
        )

    try:
        return build(True)(x, *weights)
    except (TypeError, NotImplementedError, AttributeError):
        pass                              # pipeline_mode / pl.Buffered unsupported here
    except Exception as e:
        msg = str(e).lower()
        if "buffer" not in msg and "pipeline" not in msg:
            raise                         # real failure (e.g. OOM): don't mask it
    # Fallback: default double-buffered weight blocks (identical numerics).
    return build(False)(x, *weights)


# --------------------------- parameters (glue) --------------------------------
def init_params(key, dim, num_heads, dim_head, mlp_ratio=4):
    weight_dim = num_heads * dim_head
    hid = dim * mlp_ratio
    ks = jax.random.split(key, 12)
    p = {
        "W_qkv": jax.random.normal(ks[0], (3 * weight_dim, dim), jnp.float32) * 0.1,
        "W_out": jax.random.normal(ks[1], (dim, weight_dim), jnp.float32) * 0.1,
        "b_out": jax.random.normal(ks[2], (dim,), jnp.float32) * 0.1,
        "g1": 1.0 + 0.1 * jax.random.normal(ks[3], (dim,), jnp.float32),
        "b1": 0.1 * jax.random.normal(ks[4], (dim,), jnp.float32),
        "g2": 1.0 + 0.1 * jax.random.normal(ks[5], (dim,), jnp.float32),
        "b2": 0.1 * jax.random.normal(ks[6], (dim,), jnp.float32),
        "W1": jax.random.normal(ks[7], (hid, dim), jnp.float32) * 0.1,
        "bias1": jax.random.normal(ks[8], (hid,), jnp.float32) * 0.1,
        "W2": jax.random.normal(ks[9], (dim, hid), jnp.float32) * 0.1,
        "bias2": jax.random.normal(ks[10], (dim,), jnp.float32) * 0.1,
    }
    # Discriminator spectral renorm: W * init_spect_norm / max(s). On the first
    # forward the weight is unchanged, so the scale is exactly 1.0. Any later
    # forward after a weight update must recompute this ratio wrapper-side.
    s_init = jnp.max(jnp.linalg.svd(p["W_qkv"], compute_uv=False))
    s_fwd = jnp.max(jnp.linalg.svd(p["W_qkv"], compute_uv=False))
    p["W_qkv_eff"] = p["W_qkv"] * (s_init / s_fwd)
    return p


def to_kernel_params(p, dim, num_heads, dim_head, compute_dtype=jnp.bfloat16):
    """Fold the 'b t (d k h) -> k b h t d' rearrange into a weight-row permutation,
    fuse QKV into one pre-transposed (3*H*Dh, D) weight, fold LN affines into the
    following weights/biases, reshape W_out to per-head (H, Dh, D), and cast
    matmul weights to the MXU compute dtype."""
    H, Dh = num_heads, dim_head
    HD = H * Dh
    # nn.Linear row index f = d*(3*H) + k*H + h ('(d k h)') -> reorder to (k, h, d).
    W = p["W_qkv_eff"]                                              # (3*HD, dim)
    W_perm = W.reshape(Dh, 3, H, dim).transpose(1, 2, 0, 3).reshape(3 * HD, dim)
    # Fold LN1 affine: W_perm @ (xhat*g1 + b1)^T = (W_perm*g1) @ xhat^T + W_perm@b1
    wqkv = (W_perm * p["g1"][None, :]).astype(compute_dtype)        # (3HD, dim)
    bqkv = (W_perm @ p["b1"]).reshape(3 * HD, 1).astype(jnp.float32)

    # Per-head output projection: W_out.T (HD, dim) -> (H, Dh, dim).
    wo = p["W_out"].T.reshape(H, Dh, dim).astype(compute_dtype)
    bo = p["b_out"].reshape(1, dim).astype(jnp.float32)

    # Fold LN2 affine into MLP linear1.
    w1 = p["W1"].T                                                  # (dim, hid)
    w1_f = (p["g2"][:, None] * w1).astype(compute_dtype)
    b1_f = (p["bias1"] + p["b2"] @ w1).reshape(1, -1).astype(jnp.float32)
    w2 = p["W2"].T.astype(compute_dtype)
    b2 = p["bias2"].reshape(1, dim).astype(jnp.float32)
    return (wqkv, bqkv, wo, bo, w1_f, b1_f, w2, b2)


# --------------------------- plain-JAX reference ------------------------------
def reference(x, p, num_heads, dim_head):
    B, T, D = x.shape

    def ln(z, g, b):
        mu = z.mean(-1, keepdims=True)
        var = ((z - mu) ** 2).mean(-1, keepdims=True)
        return (z - mu) / jnp.sqrt(var + EPS) * g + b

    x1 = ln(x, p["g1"], p["b1"])
    qkv = jnp.einsum("btd,fd->btf", x1, p["W_qkv_eff"])
    qkv = qkv.reshape(B, T, dim_head, 3, num_heads)          # '(d k h)'
    qkv = jnp.transpose(qkv, (3, 0, 4, 1, 2))                # k b h t d
    q, k, v = qkv[0], qkv[1], qkv[2]
    d2 = jnp.sum((q[..., :, None, :] - k[..., None, :, :]) ** 2, axis=-1)
    attn = jnp.sqrt(jnp.maximum(d2, 0.0)) * (D ** -0.5)
    p_attn = jax.nn.softmax(attn, axis=-1)
    r = jnp.einsum("bhij,bhjd->bhid", p_attn, v)
    r = jnp.transpose(r, (0, 2, 1, 3)).reshape(B, T, num_heads * dim_head)
    x = x + (r @ p["W_out"].T + p["b_out"])
    x2 = ln(x, p["g2"], p["b2"])
    h = jax.nn.gelu(x2 @ p["W1"].T + p["bias1"], approximate=False)
    return x + (h @ p["W2"].T + p["bias2"])


# --------------------------------- main ---------------------------------------
if __name__ == "__main__":
    B, T, dim = 2, 8, 32
    num_heads, dim_head, mlp_ratio = 4, 8, 4

    key = jax.random.PRNGKey(0)
    kx, kp = jax.random.split(key)
    x = jax.random.normal(kx, (B, T, dim), jnp.float32)
    params = init_params(kp, dim, num_heads, dim_head, mlp_ratio)
    kparams = to_kernel_params(params, dim, num_heads, dim_head)

    out = dencoder_block(x, kparams, num_heads=num_heads, dim_head=dim_head)
    out = jax.block_until_ready(out)

    ref = reference(x, params, num_heads, dim_head)
    err = float(jnp.max(jnp.abs(out - ref)))
    assert err < 5e-2, f"mismatch vs reference: max abs err = {err}"
    print("KERNEL_OK")
</pallas_src>

<mosaic_0001>
module attributes {stable_mosaic.version = 11 : i64} {
  func.func @_dencoder_kernel(%arg0: i32, %arg1: memref<1x8x32xf32, #tpu.memory_space<vmem>>, %arg2: memref<96x32xbf16, #tpu.memory_space<vmem>>, %arg3: memref<96x1xf32, #tpu.memory_space<vmem>>, %arg4: memref<4x8x32xbf16, #tpu.memory_space<vmem>>, %arg5: memref<1x32xf32, #tpu.memory_space<vmem>>, %arg6: memref<32x128xbf16, #tpu.memory_space<vmem>>, %arg7: memref<1x128xf32, #tpu.memory_space<vmem>>, %arg8: memref<128x32xbf16, #tpu.memory_space<vmem>>, %arg9: memref<1x32xf32, #tpu.memory_space<vmem>>, %arg10: memref<1x8x32xf32, #tpu.memory_space<vmem>>) attributes {dimension_semantics = [#tpu.dimension_semantics<parallel>], iteration_bounds = array<i64: 2>, scalar_prefetch = 0 : i64, scratch_operands = 0 : i64, tpu.core_type = #tpu.core_type<tc>, window_params = [{transform_indices = @transform_0, window_bounds = array<i64: 1, 8, 32>}, {pipeline_mode = #tpu.pipeline_mode<synchronous>, transform_indices = @transform_1, window_bounds = array<i64: 96, 32>}, {pipeline_mode = #tpu.pipeline_mode<synchronous>, transform_indices = @transform_2, window_bounds = array<i64: 96, 1>}, {pipeline_mode = #tpu.pipeline_mode<synchronous>, transform_indices = @transform_3, window_bounds = array<i64: 4, 8, 32>}, {pipeline_mode = #tpu.pipeline_mode<synchronous>, transform_indices = @transform_4, window_bounds = array<i64: 1, 32>}, {pipeline_mode = #tpu.pipeline_mode<synchronous>, transform_indices = @transform_5, window_bounds = array<i64: 32, 128>}, {pipeline_mode = #tpu.pipeline_mode<synchronous>, transform_indices = @transform_6, window_bounds = array<i64: 1, 128>}, {pipeline_mode = #tpu.pipeline_mode<synchronous>, transform_indices = @transform_7, window_bounds = array<i64: 128, 32>}, {pipeline_mode = #tpu.pipeline_mode<synchronous>, transform_indices = @transform_8, window_bounds = array<i64: 1, 32>}, {transform_indices = @transform_9, window_bounds = array<i64: 1, 8, 32>}]} {
    %c0 = arith.constant 0 : index
    %c0_0 = arith.constant 0 : index
    %c0_1 = arith.constant 0 : index
    %0 = vector.load %arg1[%c0, %c0_0, %c0_1] : memref<1x8x32xf32, #tpu.memory_space<vmem>>, vector<1x8x32xf32>
    %1 = vector.shape_cast %0 : vector<1x8x32xf32> to vector<8x32xf32>
    %cst = arith.constant dense<0.000000e+00> : vector<8xf32>
    %2 = vector.multi_reduction <add>, %1, %cst [1] : vector<8x32xf32> to vector<8xf32>
    %3 = vector.shape_cast %2 : vector<8xf32> to vector<8x1xf32>
    %cst_2 = arith.constant 3.200000e+01 : f32
    %4 = vector.broadcast %cst_2 : f32 to vector<8x1xf32>
    %5 = arith.divf %3, %4 : vector<8x1xf32>
    %6 = vector.broadcast %5 : vector<8x1xf32> to vector<8x32xf32>
    %7 = arith.subf %1, %6 : vector<8x32xf32>
    %8 = arith.mulf %7, %7 : vector<8x32xf32>
    %cst_3 = arith.constant dense<0.000000e+00> : vector<8xf32>
    %9 = vector.multi_reduction <add>, %8, %cst_3 [1] : vector<8x32xf32> to vector<8xf32>
    %10 = vector.shape_cast %9 : vector<8xf32> to vector<8x1xf32>
    %cst_4 = arith.constant 3.200000e+01 : f32
    %11 = vector.broadcast %cst_4 : f32 to vector<8x1xf32>
    %12 = arith.divf %10, %11 : vector<8x1xf32>
    %13 = vector.broadcast %5 : vector<8x1xf32> to vector<8x32xf32>
    %14 = arith.subf %1, %13 : vector<8x32xf32>
    %cst_5 = arith.constant 9.99999974E-6 : f32
    %15 = vector.broadcast %cst_5 : f32 to vector<8x1xf32>
    %16 = arith.addf %12, %15 : vector<8x1xf32>
    %17 = math.rsqrt %16 : vector<8x1xf32>
    %18 = vector.broadcast %17 : vector<8x1xf32> to vector<8x32xf32>
    %19 = arith.mulf %14, %18 : vector<8x32xf32>
    %c0_6 = arith.constant 0 : index
    %c0_7 = arith.constant 0 : index
    %20 = vector.load %arg2[%c0_6, %c0_7] : memref<96x32xbf16, #tpu.memory_space<vmem>>, vector<96x32xbf16>
    %21 = arith.truncf %19 : vector<8x32xf32> to vector<8x32xbf16>
    %cst_8 = arith.constant dense<0.000000e+00> : vector<96x8xf32>
    %22 = tpu.matmul %20, %21, %cst_8 {dimension_numbers = #tpu.dot_dimension_numbers<[1], [1], [0], [0], [0, 0, 1, 0], [], []>} : vector<96x32xbf16>, vector<8x32xbf16>, vector<96x8xf32> -> vector<96x8xf32>
    %c0_9 = arith.constant 0 : index
    %c0_10 = arith.constant 0 : index
    %23 = vector.load %arg3[%c0_9, %c0_10] : memref<96x1xf32, #tpu.memory_space<vmem>>, vector<96x1xf32>
    %24 = vector.broadcast %23 : vector<96x1xf32> to vector<96x8xf32>
    %25 = arith.addf %22, %24 : vector<96x8xf32>
    %26 = vector.extract_strided_slice %25 {offsets = [0, 0], sizes = [32, 8], strides = [1, 1]} : vector<96x8xf32> to vector<32x8xf32>
    %27 = vector.shape_cast %26 : vector<32x8xf32> to vector<4x8x8xf32>
    %28 = vector.extract_strided_slice %25 {offsets = [32, 0], sizes = [32, 8], strides = [1, 1]} : vector<96x8xf32> to vector<32x8xf32>
    %29 = vector.shape_cast %28 : vector<32x8xf32> to vector<4x8x8xf32>
    %30 = vector.extract_strided_slice %25 {offsets = [64, 0], sizes = [32, 8], strides = [1, 1]} : vector<96x8xf32> to vector<32x8xf32>
    %31 = vector.shape_cast %30 : vector<32x8xf32> to vector<4x8x8xf32>
    %32 = tpu.transpose %27, [0, 2, 1] : vector<4x8x8xf32> -> vector<4x8x8xf32>
    %33 = arith.mulf %32, %32 : vector<4x8x8xf32>
    %cst_11 = arith.constant dense<0.000000e+00> : vector<4x8xf32>
    %34 = vector.multi_reduction <add>, %33, %cst_11 [2] : vector<4x8x8xf32> to vector<4x8xf32>
    %35 = vector.shape_cast %34 : vector<4x8xf32> to vector<4x8x1xf32>
    %36 = arith.mulf %29, %29 : vector<4x8x8xf32>
    %cst_12 = arith.constant dense<0.000000e+00> : vector<4x8xf32>
    %37 = vector.multi_reduction <add>, %36, %cst_12 [1] : vector<4x8x8xf32> to vector<4x8xf32>
    %38 = vector.shape_cast %37 : vector<4x8xf32> to vector<4x1x8xf32>
    %39 = arith.truncf %32 : vector<4x8x8xf32> to vector<4x8x8xbf16>
    %40 = arith.truncf %29 : vector<4x8x8xf32> to vector<4x8x8xbf16>
    %cst_13 = arith.constant dense<0.000000e+00> : vector<4x8x8xf32>
    %41 = tpu.matmul %39, %40, %cst_13 {dimension_numbers = #tpu.dot_dimension_numbers<[2], [1], [1], [2], [0, 0, 0, 1, 1, 2], [0], [0]>} : vector<4x8x8xbf16>, vector<4x8x8xbf16>, vector<4x8x8xf32> -> vector<4x8x8xf32>
    %42 = vector.broadcast %35 : vector<4x8x1xf32> to vector<4x8x8xf32>
    %43 = vector.broadcast %38 : vector<4x1x8xf32> to vector<4x8x8xf32>
    %44 = arith.addf %42, %43 : vector<4x8x8xf32>
    %cst_14 = arith.constant 2.000000e+00 : f32
    %45 = vector.broadcast %cst_14 : f32 to vector<4x8x8xf32>
    %46 = arith.mulf %45, %41 : vector<4x8x8xf32>
    %47 = arith.subf %44, %46 : vector<4x8x8xf32>
    %cst_15 = arith.constant 0.000000e+00 : f32
    %48 = vector.broadcast %cst_15 : f32 to vector<4x8x8xf32>
    %49 = arith.maximumf %47, %48 : vector<4x8x8xf32>
    %50 = math.sqrt %49 : vector<4x8x8xf32>
    %cst_16 = arith.constant 0.176776692 : f32
    %51 = vector.broadcast %cst_16 : f32 to vector<4x8x8xf32>
    %52 = arith.mulf %50, %51 : vector<4x8x8xf32>
    %cst_17 = arith.constant dense<0xFF800000> : vector<4x8xf32>
    %53 = vector.multi_reduction <maximumf>, %52, %cst_17 [2] : vector<4x8x8xf32> to vector<4x8xf32>
    %54 = vector.shape_cast %53 : vector<4x8xf32> to vector<4x8x1xf32>
    %55 = vector.broadcast %54 : vector<4x8x1xf32> to vector<4x8x8xf32>
    %56 = arith.subf %52, %55 : vector<4x8x8xf32>
    %57 = math.exp %56 : vector<4x8x8xf32>
    %cst_18 = arith.constant dense<0.000000e+00> : vector<4x8xf32>
    %58 = vector.multi_reduction <add>, %57, %cst_18 [2] : vector<4x8x8xf32> to vector<4x8xf32>
    %59 = vector.shape_cast %58 : vector<4x8xf32> to vector<4x8x1xf32>
    %60 = arith.truncf %57 : vector<4x8x8xf32> to vector<4x8x8xbf16>
    %61 = arith.truncf %31 : vector<4x8x8xf32> to vector<4x8x8xbf16>
    %cst_19 = arith.constant dense<0.000000e+00> : vector<4x8x8xf32>
    %62 = tpu.matmul %60, %61, %cst_19 {dimension_numbers = #tpu.dot_dimension_numbers<[2], [2], [1], [1], [0, 0, 0, 1, 1, 1], [0], [0]>} : vector<4x8x8xbf16>, vector<4x8x8xbf16>, vector<4x8x8xf32> -> vector<4x8x8xf32>
    %63 = tpu.reciprocal %59 {approx = true} : vector<4x8x1xf32> -> vector<4x8x1xf32>
    %64 = vector.broadcast %63 : vector<4x8x1xf32> to vector<4x8x8xf32>
    %65 = arith.mulf %62, %64 : vector<4x8x8xf32>
    %66 = arith.truncf %65 : vector<4x8x8xf32> to vector<4x8x8xbf16>
    %c0_20 = arith.constant 0 : index
    %c0_21 = arith.constant 0 : index
    %c0_22 = arith.constant 0 : index
    %67 = vector.load %arg4[%c0_20, %c0_21, %c0_22] : memref<4x8x32xbf16, #tpu.memory_space<vmem>>, vector<4x8x32xbf16>
    %cst_23 = arith.constant dense<0.000000e+00> : vector<4x8x32xf32>
    %68 = tpu.matmul %66, %67, %cst_23 {dimension_numbers = #tpu.dot_dimension_numbers<[2], [1], [1], [2], [0, 0, 0, 1, 1, 2], [0], [0]>} : vector<4x8x8xbf16>, vector<4x8x32xbf16>, vector<4x8x32xf32> -> vector<4x8x32xf32>
    %cst_24 = arith.constant dense<0.000000e+00> : vector<8x32xf32>
    %69 = vector.multi_reduction <add>, %68, %cst_24 [0] : vector<4x8x32xf32> to vector<8x32xf32>
    %70 = arith.addf %1, %69 : vector<8x32xf32>
    %c0_25 = arith.constant 0 : index
    %c0_26 = arith.constant 0 : index
    %71 = vector.load %arg5[%c0_25, %c0_26] : memref<1x32xf32, #tpu.memory_space<vmem>>, vector<1x32xf32>
    %72 = vector.broadcast %71 : vector<1x32xf32> to vector<8x32xf32>
    %73 = arith.addf %70, %72 : vector<8x32xf32>
    %cst_27 = arith.constant dense<0.000000e+00> : vector<8xf32>
    %74 = vector.multi_reduction <add>, %73, %cst_27 [1] : vector<8x32xf32> to vector<8xf32>
    %75 = vector.shape_cast %74 : vector<8xf32> to vector<8x1xf32>
    %cst_28 = arith.constant 3.200000e+01 : f32
    %76 = vector.broadcast %cst_28 : f32 to vector<8x1xf32>
    %77 = arith.divf %75, %76 : vector<8x1xf32>
    %78 = vector.broadcast %77 : vector<8x1xf32> to vector<8x32xf32>
    %79 = arith.subf %73, %78 : vector<8x32xf32>
    %80 = arith.mulf %79, %79 : vector<8x32xf32>
    %cst_29 = arith.constant dense<0.000000e+00> : vector<8xf32>
    %81 = vector.multi_reduction <add>, %80, %cst_29 [1] : vector<8x32xf32> to vector<8xf32>
    %82 = vector.shape_cast %81 : vector<8xf32> to vector<8x1xf32>
    %cst_30 = arith.constant 3.200000e+01 : f32
    %83 = vector.broadcast %cst_30 : f32 to vector<8x1xf32>
    %84 = arith.divf %82, %83 : vector<8x1xf32>
    %85 = vector.broadcast %77 : vector<8x1xf32> to vector<8x32xf32>
    %86 = arith.subf %73, %85 : vector<8x32xf32>
    %cst_31 = arith.constant 9.99999974E-6 : f32
    %87 = vector.broadcast %cst_31 : f32 to vector<8x1xf32>
    %88 = arith.addf %84, %87 : vector<8x1xf32>
    %89 = math.rsqrt %88 : vector<8x1xf32>
    %90 = vector.broadcast %89 : vector<8x1xf32> to vector<8x32xf32>
    %91 = arith.mulf %86, %90 : vector<8x32xf32>
    %92 = arith.truncf %91 : vector<8x32xf32> to vector<8x32xbf16>
    %c0_32 = arith.constant 0 : index
    %c0_33 = arith.constant 0 : index
    %93 = vector.load %arg6[%c0_32, %c0_33] : memref<32x128xbf16, #tpu.memory_space<vmem>>, vector<32x128xbf16>
    %cst_34 = arith.constant dense<0.000000e+00> : vector<8x128xf32>
    %94 = tpu.matmul %92, %93, %cst_34 {dimension_numbers = #tpu.dot_dimension_numbers<[1], [0], [0], [1], [0, 0, 1, 1], [], []>} : vector<8x32xbf16>, vector<32x128xbf16>, vector<8x128xf32> -> vector<8x128xf32>
    %c0_35 = arith.constant 0 : index
    %c0_36 = arith.constant 0 : index
    %95 = vector.load %arg7[%c0_35, %c0_36] : memref<1x128xf32, #tpu.memory_space<vmem>>, vector<1x128xf32>
    %96 = vector.broadcast %95 : vector<1x128xf32> to vector<8x128xf32>
    %97 = arith.addf %94, %96 : vector<8x128xf32>
    %cst_37 = arith.constant 5.000000e-01 : f32
    %98 = vector.broadcast %cst_37 : f32 to vector<8x128xf32>
    %99 = arith.mulf %98, %97 : vector<8x128xf32>
    %cst_38 = arith.constant 0.707106769 : f32
    %100 = vector.broadcast %cst_38 : f32 to vector<8x128xf32>
    %101 = arith.mulf %97, %100 : vector<8x128xf32>
    %102 = math.erf %101 : vector<8x128xf32>
    %cst_39 = arith.constant 1.000000e+00 : f32
    %103 = vector.broadcast %cst_39 : f32 to vector<8x128xf32>
    %104 = arith.addf %103, %102 : vector<8x128xf32>
    %105 = arith.mulf %99, %104 : vector<8x128xf32>
    %106 = arith.truncf %105 : vector<8x128xf32> to vector<8x128xbf16>
    %c0_40 = arith.constant 0 : index
    %c0_41 = arith.constant 0 : index
    %107 = vector.load %arg8[%c0_40, %c0_41] : memref<128x32xbf16, #tpu.memory_space<vmem>>, vector<128x32xbf16>
    %cst_42 = arith.constant dense<0.000000e+00> : vector<8x32xf32>
    %108 = tpu.matmul %106, %107, %cst_42 {dimension_numbers = #tpu.dot_dimension_numbers<[1], [0], [0], [1], [0, 0, 1, 1], [], []>} : vector<8x128xbf16>, vector<128x32xbf16>, vector<8x32xf32> -> vector<8x32xf32>
    %c0_43 = arith.constant 0 : index
    %c0_44 = arith.constant 0 : index
    %109 = vector.load %arg9[%c0_43, %c0_44] : memref<1x32xf32, #tpu.memory_space<vmem>>, vector<1x32xf32>
    %110 = vector.broadcast %109 : vector<1x32xf32> to vector<8x32xf32>
    %111 = arith.addf %108, %110 : vector<8x32xf32>
    %112 = arith.addf %73, %111 : vector<8x32xf32>
    %c0_45 = arith.constant 0 : index
    %c0_46 = arith.constant 0 : index
    %c0_47 = arith.constant 0 : index
    %113 = vector.load %arg10[%c0_45, %c0_46, %c0_47] : memref<1x8x32xf32, #tpu.memory_space<vmem>>, vector<1x8x32xf32>
    %114 = vector.shape_cast %113 : vector<1x8x32xf32> to vector<8x32xf32>
    %115 = vector.shape_cast %112 : vector<8x32xf32> to vector<1x8x32xf32>
    tpu.vector_store %arg10[%c0_45, %c0_46, %c0_47], %115 {strides = array<i32>} : memref<1x8x32xf32, #tpu.memory_space<vmem>>, vector<1x8x32xf32>,
    return
  }
  func.func @transform_0(%arg0: i32) -> (i32, i32, i32) {
    %c0_i32 = arith.constant 0 : i32
    %c0_i32_0 = arith.constant 0 : i32
    %c0_i32_1 = arith.constant 0 : i32
    return %arg0, %c0_i32, %c0_i32_0 : i32, i32, i32
  }
  func.func @transform_1(%arg0: i32) -> (i32, i32) {
    %c0_i32 = arith.constant 0 : i32
    %c0_i32_0 = arith.constant 0 : i32
    %c0_i32_1 = arith.constant 0 : i32
    return %c0_i32, %c0_i32_0 : i32, i32
  }
  func.func @transform_2(%arg0: i32) -> (i32, i32) {
    %c0_i32 = arith.constant 0 : i32
    %c0_i32_0 = arith.constant 0 : i32
    %c0_i32_1 = arith.constant 0 : i32
    return %c0_i32, %c0_i32_0 : i32, i32
  }
  func.func @transform_3(%arg0: i32) -> (i32, i32, i32) {
    %c0_i32 = arith.constant 0 : i32
    %c0_i32_0 = arith.constant 0 : i32
    %c0_i32_1 = arith.constant 0 : i32
    %c0_i32_2 = arith.constant 0 : i32
    return %c0_i32, %c0_i32_0, %c0_i32_1 : i32, i32, i32
  }
  func.func @transform_4(%arg0: i32) -> (i32, i32) {
    %c0_i32 = arith.constant 0 : i32
    %c0_i32_0 = arith.constant 0 : i32
    %c0_i32_1 = arith.constant 0 : i32
    return %c0_i32, %c0_i32_0 : i32, i32
  }
  func.func @transform_5(%arg0: i32) -> (i32, i32) {
    %c0_i32 = arith.constant 0 : i32
    %c0_i32_0 = arith.constant 0 : i32
    %c0_i32_1 = arith.constant 0 : i32
    return %c0_i32, %c0_i32_0 : i32, i32
  }
  func.func @transform_6(%arg0: i32) -> (i32, i32) {
    %c0_i32 = arith.constant 0 : i32
    %c0_i32_0 = arith.constant 0 : i32
    %c0_i32_1 = arith.constant 0 : i32
    return %c0_i32, %c0_i32_0 : i32, i32
  }
  func.func @transform_7(%arg0: i32) -> (i32, i32) {
    %c0_i32 = arith.constant 0 : i32
    %c0_i32_0 = arith.constant 0 : i32
    %c0_i32_1 = arith.constant 0 : i32
    return %c0_i32, %c0_i32_0 : i32, i32
  }
  func.func @transform_8(%arg0: i32) -> (i32, i32) {
    %c0_i32 = arith.constant 0 : i32
    %c0_i32_0 = arith.constant 0 : i32
    %c0_i32_1 = arith.constant 0 : i32
    return %c0_i32, %c0_i32_0 : i32, i32
  }
  func.func @transform_9(%arg0: i32) -> (i32, i32, i32) {
    %c0_i32 = arith.constant 0 : i32
    %c0_i32_0 = arith.constant 0 : i32
    %c0_i32_1 = arith.constant 0 : i32
    return %arg0, %c0_i32, %c0_i32_0 : i32, i32, i32
  }
}

</mosaic_0001>

<bundles_post_ra>
// kernel: tpu_custom_call.1
= control target key start
LH: loop header
LB: loop body
LE: loop exit
PB: predicated region body
PF: predicated region fallthrough
CT: control target
= control target key end

     0   :  { %14 = vsyncpa [#allocation3], 0  ;;  %s1934_s0 = inlined_call_operand.vmem [shape: f32[2,8,32], index: 0, kind: input, shape index: {}]   ;;  %s1935_s1 = inlined_call_operand.vmem [shape: bf16[96,32], index: 1, kind: input, shape index: {}]   ;;  %s1936_s2 = inlined_call_operand.vmem [shape: f32[96,1], index: 2, kind: input, shape index: {}]   ;;  %s1937_s3 = inlined_call_operand.vmem [shape: bf16[4,8,32], index: 3, kind: input, shape index: {}]   ;;  %s1938_s4 = inlined_call_operand.vmem [shape: f32[1,32], index: 4, kind: input, shape index: {}]   ;;  %s1939_s5 = inlined_call_operand.vmem [shape: bf16[32,128], index: 5, kind: input, shape index: {}]   ;;  %s1940_s6 = inlined_call_operand.vmem [shape: f32[1,128], index: 6, kind: input, shape index: {}]   ;;  %s1941_s7 = inlined_call_operand.vmem [shape: bf16[128,32], index: 7, kind: input, shape index: {}]   ;;  %s1942_s8 = inlined_call_operand.vmem [shape: f32[1,32], index: 8, kind: input, shape index: {}]   ;;  %s1943_s9 = inlined_call_operand.hbm [shape: f32[2,8,32], index: 9, kind: output, shape index: {}]  }
   0x1   :  { %16 = vsyncpa [#allocation3 + $0x1], 0  ;;  %s1658_s30 = smov 0   ;;  %s1660_s10 = smov 0  }
   0x2   :  { %s1662_s11 = smov 0   ;;  %s1664_s12 = smov 0  }
   0x3 LB: > { %s1679_s13 = sadd.s32 4294967295, %s1604_s12   ;;  %s1352_s14 = sadd.s32 4294967294, %s1604_s12   ;;  %s1604_s12 = sphi %s1664_s12, %s1949_s12   ;;  %s1600_s11 = sphi %s1662_s11, %s1948_s11   ;;  %s1596_s10 = sphi %s1660_s10, %s1947_s10   ;;  %s1592_s30 = sphi %s1658_s30, %s1946_s30  }
   0x4   : > { %s1683_s15 = sadd.s32 1, %s1604_s12   ;;  %s223_s16 = sadd.s32 1, %s1600_s11 }
   0x5   : > { %s220_s17 = ssub.s32 %s1604_s12, %s1683_s15  ;;  %p233_p0 = scmp.ne.s32.totalorder %s1600_s11, %s1596_s10 }
   0x6   : > { %p221_p1 = scmp.eq.s32.totalorder %s220_s17, 0  ;;  %p234_p2 = scmp.eq.s32.totalorder %s1679_s13, 1 }
   0x7   : > { %p239_p3 = scmp.ne.s32.totalorder %s1596_s10, %s1592_s30  ;;  %p240_p4 = scmp.eq.s32.totalorder %s1352_s14, 1 }
   0x8   : > { %s1694_s18 = scalar_select %p221_p1, %s1600_s11, %s223_s16  }
   0x9   : > { %p1696_p5 = por %p234_p2, %p233_p0  ;;  %p1700_p6 = por %p240_p4, %p239_p3 }
   0xa   : > { %p1355_p7 = scmp.ge.s32.totalorder %s1604_s12, 1  ;;  %p289_p8 = scmp.lt.s32.totalorder %s1604_s12, 3 }
   0xc   : > { %p290_p9 = pnand %p1355_p7, %p289_p8 }
   0xd   : > { %p324_p10 = scmp.lt.s32.totalorder (!%p290_p9), %s1679_s13, 1  ;;  %s1443_s24 = sshll.u32 (!%p290_p9), %s1679_s13, 3 }
   0xe   : > { %293 = sbr.rel (%p290_p9) target bundleno = 1770 (0x6ea), region = 56  ;;  %s1288_s29 = scalar_lea.hbm (!%p290_p9), %s1943_s9, %s1443_s24 }
   0xf   : > { %s1292_s17 = sshll.u32 (!%p290_p9), %s1288_s29, 4  ;;  %s1293_s17 = int_to_ptr.hbm [resolvable:$true] %s1292_s17 }
  0x13   : > { %s325_s21 = scalar_select %p324_p10, %s1679_s13, 1  ;;  %vm330_vm0 = vcmask 261120   ;;  %v1606_v2 = vmov 32.0   ;;  %v373_v14 = vld [vmem:[%s1936_s2] sm:$0xff]  ;;  %v1607_v15 = vmov 0   ;;  %v374_v16 = vld [vmem:[%s1936_s2 + $0x8] sm:$0xff] }
  0x14   : > { %1510 = vrcp.f32 %v1606_v2  ;;  %1504 = vset.pattern.permute.xlu1 %v1607_v15  ;;  %1506 = vset.pattern.permute.xlu0 %v1607_v15  ;;  %v378_v20 = vld [vmem:[%s1936_s2 + $0x28] sm:$0xff]  ;;  %v380_v21 = vld [vmem:[%s1936_s2 + $0x38] sm:$0xff]  ;;  %v1446_v32 = vld [vmem:[%s1935_s1] sm:$0xff]  ;;  %vm723_vm5 = vcmask 1043456   ;;  %vm667_vm6 = vcmask 64512  }
  0x15   : > { %s1357_s22 = sshll.u32 %s325_s21, 3  ;;  %387 = vperm.xlu1 %1504, %v373_v14   ;;  %1505 = vset.pattern.permute.xlu2 %v1607_v15  ;;  %v376_v33 = vld [vmem:[%s1936_s2 + $0x18] sm:$0xff]  ;;  %v377_v34 = vld [vmem:[%s1936_s2 + $0x20] sm:$0xff]  ;;  %v1447_v35 = vld [vmem:[%s1935_s1 + $0x8] sm:$0xff]  ;;  %s1556_s21 = sshra.s32 %s1293_s17, 4  ;;  %s1557_s21 = int_to_ptr.hbm [resolvable:$true] %s1556_s21 }
  0x16   : > { %s327_s25 = scalar_lea.vmem %s1934_s0, %s1357_s22  ;;  %407 = vperm.xlu2 %1505, %v377_v34   ;;  %v375_v36 = vld [vmem:[%s1936_s2 + $0x10] sm:$0xff]  ;;  %v1449_v39 = vld [vmem:[%s1935_s1 + $0x18] sm:$0xff]  ;;  %v1450_v54 = vld [vmem:[%s1935_s1 + $0x20] sm:$0xff]  ;;  %s321_s22 = sand.u32 1, %s1596_s10  }
  0x17   : > { %v1711_v0 = vld [vmem:[%s327_s25] sm:$0xff]  ;;  %v379_v37 = vld [vmem:[%s1936_s2 + $0x30] sm:$0xff]  ;;  %v1451_v63 = vld [vmem:[%s1935_s1 + $0x28] sm:$0xff]  ;;  %s1356_s23 = sshll.u32 %s321_s22, 3  ;;  %s1278_s13 = scalar_lea.sflag [#allocation3], %s321_s22 }
  0x18   : > { %v331_v1 = vsel %vm330_vm0, %v1711_v0, 0.0  ;;  %v1448_v38 = vld [vmem:[%s1935_s1 + $0x10] sm:$0xff]  ;;  %s323_s14 = scalar_lea.vmem [#allocation2], %s1356_s23  ;;  %s1558_s25 = scalar_lea.hbm %s1557_s21, 8 }
  0x19   : > { %332 = vadd.xlane.f32.xlu0 %v331_v1  ;;  %s1290_s16 = sshll.u32 %s323_s14, 4  ;;  %p1559_p11 = scmp.ne.s32.totalorder %s1557_s21, %s1558_s25  ;;  %s1291_s16 = int_to_ptr.vmem [resolvable:$true] %s1290_s16 }
  0x1a   : > { %v1511_v3 = vpop.eup %1510  ;;  %s1562_s23 = scalar_lea.hbm %s1943_s9, 16  ;;  %p1563_p0 = scmp.lt.s32.totalorder %s1557_s21, %s1943_s9 }
  0x1b   : > { %v335_v4 = vmul.f32 32.0, %v1511_v3  ;;  %vm339_vm1 = vweird.f32 %v1511_v3  ;;  %p1560_p12 = pnand %p1559_p11, %p1696_p5  ;;  %p1564_p1 = scmp.lt.s32.totalorder %s1562_s23, %s1558_s25 }
  0x1d   : > { %v336_v5 = vsub.f32 1.0, %v335_v4  ;;  %392 = vperm.xlu1 %1504, %v374_v16   ;;  %p1561_p13 = pneg %p1560_p12  ;;  %p1565_p2 = por %p1564_p1, %p1563_p0 }
  0x1e   : > { %397 = vperm.xlu2 %1505, %v375_v36  }
  0x1f   : > { %v337_v6 = vmul.f32 %v1511_v3, %v336_v5  ;;  %p1566_p3 = pnand %p1565_p2, %p1561_p13 }
  0x21   : > { %v338_v7 = vadd.f32 %v1511_v3, %v337_v6 }
  0x23   : > { %v1715_v8 = vsel %vm339_vm1, %v1511_v3, %v338_v7 }
  0x25   : > { %412 = vperm.xlu1 %1504, %v378_v20  }
  0x26   : > { %417 = vperm.xlu2 %1505, %v379_v37  }
  0x2d   : > { %422 = vperm.xlu1 %1504, %v380_v21  }
  0x70   : > { %v408_v43 = vpop.permute.xlu2 %407 }
  0x78   : > { %v398_v47 = vpop.permute.xlu2 %397 }
  0x80   : > { %v418_v1 = vpop.permute.xlu2 %417 }
  0x87   : > { %v388_v40 = vpop.permute.xlu1 %387 }
  0x8c   : > { %v333_v9 = vpop.xlane.xlu0 %332 }
  0x8d   : > { %v341_v10 = vmul.f32 %v1715_v8, %v333_v9 }
  0x8f   : > { %v342_v11 = vsub.f32 %v1711_v0, %v341_v10  ;;  %v393_v44 = vpop.permute.xlu1 %392 }
  0x91   : > { %v343_v12 = vmul.f32 %v342_v11, %v342_v11 }
  0x93   : > { %v344_v13 = vsel %vm330_vm0, %v343_v12, 0.0 }
  0x94   : > { %345 = vadd.xlane.f32.xlu0 %v344_v13 }
  0x97   : > { %v413_v58 = vpop.permute.xlu1 %412 }
  0x9f   : > { %v423_v6 = vpop.permute.xlu1 %422 }
  0xa8   : > { %402 = vperm.xlu0 %1506, %v376_v33  }
 0x107   : > { %v346_v17 = vpop.xlane.xlu0 %345 }
 0x108   : > { %v347_v18 = vmul.f32 %v346_v17, %v1715_v8 }
 0x10a   : > { %v348_v19 = vadd.f32 1e-05, %v347_v18 }
 0x10c   : > { %1512 = vrsqrt.f32 %v348_v19  ;;  %vm355_vm3 = vweird.f32 %v348_v19 }
 0x112   : > { %v1513_v22 = vpop.eup %1512 }
 0x113   : > { %v350_v23 = vmul.f32 %v1513_v22, %v348_v19  ;;  %vm356_vm2 = vweird.f32 %v1513_v22 }
 0x114   : > { %vm357_vm4 = vmor %vm355_vm3, %vm356_vm2 }
 0x115   : > { %v351_v24 = vmul.f32 %v1513_v22, %v350_v23  ;;  %v384_v23 = vld [vmem:[%s1936_s2 + $0x58] sm:$0xff] }
 0x117   : > { %v352_v25 = vmul.f32 0.5, %v351_v24 }
 0x119   : > { %v353_v26 = vsub.f32 1.5, %v352_v25 }
 0x11a   : > { %v403_v50 = vpop.permute.xlu0 %402 }
 0x11b   : > { %v354_v27 = vmul.f32 %v1513_v22, %v353_v26 }
 0x11d   : > { %v358_v28 = vsel %vm357_vm4, %v1513_v22, %v354_v27 }
 0x11e   : > { %v359_v29 = vmul.f32 %v358_v28, %v342_v11 }
 0x120   : > { %v372_v30 = vpack.c.bf16 %v359_v29, %v359_v29  ;;  %v381_v29 = vld [vmem:[%s1936_s2 + $0x40] sm:$0xff] }
 0x122   : > { %v494_v31 = vsel %vm330_vm0, %v372_v30, 0 }
 0x123   : > { %503 = vmatpush.bf16.xpose.msra.mxu0 %v494_v31 }
 0x12a   : > { %1382 = vmatmul.msk.bf16.vlgmr.msra.gmra.mxu0 %vm330_vm0, %v1446_v32 }
 0x13a   : > { %1383 = vmatmul.msk.bf16.gmra.mxu0 %vm330_vm0, %v1447_v35 }
 0x14a   : > { %1384 = vmatmul.msk.bf16.gmra.mxu0 %vm330_vm0, %v1448_v38 }
 0x15a   : > { %1385 = vmatmul.msk.bf16.gmra.mxu0 %vm330_vm0, %v1449_v39 }
 0x16a   : > { %1386 = vmatmul.msk.bf16.gmra.mxu0 %vm330_vm0, %v1450_v54 }
 0x17a   : > { %1387 = vmatmul.msk.bf16.gmra.mxu0 %vm330_vm0, %v1451_v63 }
 0x1a7   : > { %v505_v41 = vpop.f32.mrf.mxu0 }
 0x1a8   : > { %v506_v42 = vadd.f32 %v505_v41, %v388_v40 }
 0x1aa   : > { %535 = vxpose.xlu2.b32.start.end [1/1] (short) (narrow) %v506_v42, 8 }
 0x1af   : > { %v507_v45 = vpop.f32.mrf.mxu0 }
 0x1b0   : > { %v508_v46 = vadd.f32 %v507_v45, %v393_v44 }
 0x1b2   : > { %567 = vxpose.xlu1.b32.start.end [1/1] (short) (narrow) %v508_v46, 8 }
 0x1b7   : > { %v510_v48 = vpop.f32.mrf.mxu0 }
 0x1b8   : > { %v511_v49 = vadd.f32 %v510_v48, %v398_v47 }
 0x1ba   : > { %599 = vxpose.xlu0.b32.start.end [1/1] (short) (narrow) %v511_v49, 8 }
 0x1bf   : > { %v512_v51 = vpop.f32.mrf.mxu0 }
 0x1c0   : > { %v513_v52 = vadd.f32 %v512_v51, %v403_v50 }
 0x1c2   : > { %631 = vxpose.xlu2.b32.start.end [1/1] (short) (narrow) %v513_v52, 8 }
 0x1c7   : > { %v515_v53 = vpop.f32.mrf.mxu0 }
 0x1c8   : > { %v516_v55 = vadd.f32 %v515_v53, %v408_v43 }
 0x1ca   : > { %v716_v56 = vpack.c.bf16 %v516_v55, %v516_v55  ;;  %v680_v30 = vmul.f32 %v516_v55, %v516_v55 }
 0x1cc   : > { %v725_v57 = vsel %vm723_vm5, %v716_v56, 0  ;;  %v684_v31 = vsel %vm667_vm6, %v680_v30, 0.0 }
 0x1cd   : > { %734 = vmatpush.bf16.msra.mxu1 %v725_v57  ;;  %v685_v32 = vrot.slane %v684_v31, 4 }
 0x1cf   : > { %v517_v59 = vpop.f32.mrf.mxu0  ;;  %v686_v33 = vadd.f32 %v685_v32, %v684_v31 }
 0x1d0   : > { %v518_v60 = vadd.f32 %v517_v59, %v413_v58 }
 0x1d1   : > { %v687_v34 = vrot.slane %v686_v33, 2 }
 0x1d2   : > { %v717_v61 = vpack.c.bf16 %v518_v60, %v518_v60  ;;  %v681_v38 = vmul.f32 %v518_v60, %v518_v60 }
 0x1d3   : > { %v688_v35 = vadd.f32 %v687_v34, %v686_v33 }
 0x1d4   : > { %v744_v62 = vsel %vm723_vm5, %v717_v61, 0  ;;  %v691_v43 = vsel %vm667_vm6, %v681_v38, 0.0 }
 0x1d5   : > { %753 = vmatpush.bf16.msra.mxu2 %v744_v62  ;;  %v689_v36 = vrot.slane %v688_v35, 1  ;;  %v692_v48 = vrot.slane %v691_v43, 4 }
 0x1d7   : > { %v520_v2 = vpop.f32.mrf.mxu0  ;;  %v690_v40 = vadd.f32 %v689_v36, %v688_v35  ;;  %v693_v52 = vadd.f32 %v692_v48, %v691_v43 }
 0x1d8   : > { %v521_v3 = vadd.f32 %v520_v2, %v418_v1 }
 0x1d9   : > { %v694_v58 = vrot.slane %v693_v52, 2 }
 0x1da   : > { %v718_v4 = vpack.c.bf16 %v521_v3, %v521_v3  ;;  %v682_v49 = vmul.f32 %v521_v3, %v521_v3 }
 0x1db   : > { %v695_v63 = vadd.f32 %v694_v58, %v693_v52 }
 0x1dc   : > { %v763_v5 = vsel %vm723_vm5, %v718_v4, 0  ;;  %v698_v54 = vsel %vm667_vm6, %v682_v49, 0.0 }
 0x1dd   : > { %772 = vmatpush.bf16.msra.mxu3 %v763_v5  ;;  %v699_v57 = vrot.slane %v698_v54, 4  ;;  %v696_v5 = vrot.slane %v695_v63, 1 }
 0x1df   : > { %v522_v7 = vpop.f32.mrf.mxu0  ;;  %v700_v62 = vadd.f32 %v699_v57, %v698_v54 }
 0x1e0   : > { %v523_v9 = vadd.f32 %v522_v7, %v423_v6 }
 0x1e1   : > { %v701_v6 = vrot.slane %v700_v62, 2 }
 0x1e2   : > { %v719_v10 = vpack.c.bf16 %v523_v9, %v523_v9  ;;  %v683_v37 = vmul.f32 %v523_v9, %v523_v9 }
 0x1e4   : > { %v782_v11 = vsel %vm723_vm5, %v719_v10, 0  ;;  %v705_v41 = vsel %vm667_vm6, %v683_v37, 0.0 }
 0x1e5   : > { %791 = vmatpush.bf16.msrb.mxu1 %v782_v11  ;;  %v706_v46 = vrot.slane %v705_v41, 4 }
 0x1e7   : > { %v707_v51 = vadd.f32 %v706_v46, %v705_v41  ;;  %v1792_v55 = vpop.f32.mrf.mxu0 }
 0x1e9   : > { %v708_v56 = vrot.slane %v707_v51, 2 }
 0x1eb   : > { %v709_v61 = vadd.f32 %v708_v56, %v707_v51 }
 0x1ed   : > { %v710_v3 = vrot.slane %v709_v61, 1 }
 0x1ef   : > { %v1794_v4 = vpop.f32.mrf.mxu0 }
 0x1f7   : > { %v1798_v30 = vpop.f32.mrf.mxu0 }
 0x1ff   : > { %v532_v46 = vpop.f32.mrf.mxu0 }
 0x243   : > { %v551_v12 = vpop.trf.xlu2 }
 0x244   : > { %v663_v13 = vmul.f32 %v551_v12, %v551_v12  ;;  %v712_v14 = vpack.c.bf16 %v551_v12, %v551_v12  ;;  %v711_v12 = vadd.f32 %v710_v3, %v709_v61 }
 0x246   : > { %1388 = vmatmul.msk.bf16.vlgmr.msra.gmra.mxu1 %vm667_vm6, %v712_v14  ;;  %v668_v15 = vsel %vm667_vm6, %v663_v13, 0.0  ;;  %v697_v13 = vadd.f32 %v696_v5, %v695_v63  ;;  %v702_v14 = vadd.f32 %v701_v6, %v700_v62 }
 0x247   : > { %669 = vadd.xlane.f32.xlu2 %v668_v15 }
 0x256   : > { %v583_v16 = vpop.trf.xlu1 }
 0x257   : > { %v664_v17 = vmul.f32 %v583_v16, %v583_v16  ;;  %v713_v18 = vpack.c.bf16 %v583_v16, %v583_v16 }
 0x259   : > { %1389 = vmatmul.msk.bf16.vlgmr.msra.gmra.mxu2 %vm667_vm6, %v713_v18  ;;  %v671_v19 = vsel %vm667_vm6, %v664_v17, 0.0 }
 0x25a   : > { %672 = vadd.xlane.f32.xlu0 %v671_v19 }
 0x25b   : > { %v647_v20 = vpop.trf.xlu2 }
 0x25c   : > { %v666_v21 = vmul.f32 %v647_v20, %v647_v20  ;;  %v715_v22 = vpack.c.bf16 %v647_v20, %v647_v20 }
 0x25e   : > { %1391 = vmatmul.msk.bf16.vlgmr.msrb.gmra.mxu1 %vm667_vm6, %v715_v22  ;;  %v615_v24 = vpop.trf.xlu0  ;;  %v677_v25 = vsel %vm667_vm6, %v666_v21, 0.0 }
 0x25f   : > { %v714_v26 = vpack.c.bf16 %v615_v24, %v615_v24  ;;  %442 = vperm.xlu2 %1505, %v384_v23   ;;  %678 = vadd.xlane.f32.xlu1 %v677_v25  ;;  %v665_v27 = vmul.f32 %v615_v24, %v615_v24 }
 0x261   : > { %1390 = vmatmul.msk.bf16.vlgmr.msra.gmra.mxu3 %vm667_vm6, %v714_v26  ;;  %v674_v28 = vsel %vm667_vm6, %v665_v27, 0.0  ;;  %v703_v26 = vrot.slane %v702_v14, 1 }
 0x263   : > { %v704_v34 = vadd.f32 %v703_v26, %v702_v14 }
 0x267   : > { %675 = vadd.xlane.f32.xlu1 %v674_v28 }
 0x280   : > { %427 = vperm.xlu1 %1504, %v381_v29  }
 0x2ba   : > { %v670_v39 = vpop.xlane.xlu2 %669 }
 0x2bb   : > { %v797_v44 = vadd.f32 %v690_v40, %v670_v39 }
 0x2c2   : > { %v443_v48 = vpop.permute.xlu2 %442 }
 0x2c3   : > { %v736_v42 = vpop.f32.mrf.mxu1 }
 0x2c4   : > { %v801_v45 = vmul.f32 2.0, %v736_v42 }
 0x2c6   : > { %v805_v47 = vsub.f32 %v797_v44, %v801_v45 }
 0x2c8   : > { %v809_v50 = vmax.f32 %v805_v47, 0.0 }
 0x2ca   : > { %1514 = vrsqrt.f32 %v809_v50  ;;  %vm820_vm7 = vcmp.eq.f32.partialorder %v809_v50, inf  ;;  %v823_v20 = vand.u32 2147483648, %v809_v50  ;;  %vm822_vm8 = vcmp.eq.f32.partialorder %v809_v50, 0.0 }
 0x2cb   : > { %v738_v53 = vpop.f32.mrf.mxu1 }
 0x2cc   : > { %v533_v53 = vadd.f32 %v532_v46, %v443_v48 }
 0x2cd   : > { %v673_v11 = vpop.xlane.xlu0 %672 }
 0x2ce   : > { %v798_v21 = vadd.f32 %v697_v13, %v673_v11  ;;  %v908_v62 = vpack.c.bf16 %v533_v53, %v533_v53 }
 0x2d0   : > { %v1515_v59 = vpop.eup %1514 }
 0x2d1   : > { %v814_v60 = vmul.f32 %v1515_v59, %v809_v50 }
 0x2d2   : > { %v679_v9 = vpop.xlane.xlu1 %678 }
 0x2d3   : > { %v815_v1 = vmul.f32 %v1515_v59, %v814_v60  ;;  %v800_v17 = vadd.f32 %v711_v12, %v679_v9 }
 0x2d5   : > { %v816_v2 = vmul.f32 0.5, %v815_v1 }
 0x2d7   : > { %v817_v7 = vsub.f32 1.5, %v816_v2 }
 0x2d9   : > { %v818_v10 = vmul.f32 %v1515_v59, %v817_v7 }
 0x2da   : > { %v676_v33 = vpop.xlane.xlu1 %675 }
 0x2db   : > { %v793_v15 = vpop.f32.mrf.mxu1  ;;  %v819_v16 = vmul.f32 %v818_v10, %v809_v50  ;;  %v799_v38 = vadd.f32 %v704_v34, %v676_v33 }
 0x2dc   : > { %v804_v18 = vmul.f32 2.0, %v793_v15  ;;  %v755_v19 = vpop.f32.mrf.mxu2 }
 0x2dd   : > { %v802_v22 = vmul.f32 2.0, %v755_v19  ;;  %v821_v23 = vsel %vm820_vm7, %v809_v50, %v819_v16 }
 0x2de   : > { %v808_v24 = vsub.f32 %v800_v17, %v804_v18  ;;  %v824_v25 = vsel %vm822_vm8, %v823_v20, %v821_v23 }
 0x2df   : > { %v806_v27 = vsub.f32 %v798_v21, %v802_v22  ;;  %v1796_v28 = vmul.f32 0.17677669, %v824_v25 }
 0x2e0   : > { %v812_v29 = vmax.f32 %v808_v24, 0.0 }
 0x2e1   : > { %v810_v31 = vmax.f32 %v806_v27, 0.0  ;;  %v865_v32 = vsel %vm667_vm6, %v1796_v28, -inf  ;;  %v382_v27 = vld [vmem:[%s1936_s2 + $0x48] sm:$0xff] }
 0x2e2   : > { %866 = vmax.xlane.f32.xlu2 %v865_v32  ;;  %1516 = vrsqrt.f32 %v812_v29  ;;  %vm856_vm9 = vcmp.eq.f32.partialorder %v812_v29, inf  ;;  %vm858_vm10 = vcmp.eq.f32.partialorder %v812_v29, 0.0  ;;  %v859_v2 = vand.u32 2147483648, %v812_v29 }
 0x2e3   : > { %v795_v35 = vpop.f32.mrf.mxu1  ;;  %1518 = vrsqrt.f32 %v810_v31  ;;  %vm832_vm11 = vcmp.eq.f32.partialorder %v810_v31, inf  ;;  %v835_v9 = vand.u32 2147483648, %v810_v31  ;;  %vm834_vm12 = vcmp.eq.f32.partialorder %v810_v31, 0.0 }
 0x2e4   : > { %v757_v36 = vpop.f32.mrf.mxu2  ;;  %v774_v37 = vpop.f32.mrf.mxu3 }
 0x2e5   : > { %v803_v39 = vmul.f32 2.0, %v774_v37 }
 0x2e7   : > { %v807_v40 = vsub.f32 %v799_v38, %v803_v39 }
 0x2e8   : > { %v1517_v41 = vpop.eup %1516 }
 0x2e9   : > { %v1519_v42 = vpop.eup %1518  ;;  %v811_v43 = vmax.f32 %v807_v40, 0.0  ;;  %v850_v44 = vmul.f32 %v1517_v41, %v812_v29 }
 0x2ea   : > { %v826_v45 = vmul.f32 %v1519_v42, %v810_v31 }
 0x2eb   : > { %v851_v47 = vmul.f32 %v1517_v41, %v850_v44  ;;  %1520 = vrsqrt.f32 %v811_v43  ;;  %vm844_vm13 = vcmp.eq.f32.partialorder %v811_v43, inf  ;;  %v847_v22 = vand.u32 2147483648, %v811_v43 }
 0x2ec   : > { %v776_v49 = vpop.f32.mrf.mxu3  ;;  %v827_v50 = vmul.f32 %v1519_v42, %v826_v45  ;;  %vm846_vm14 = vcmp.eq.f32.partialorder %v811_v43, 0.0 }
 0x2ed   : > { %v852_v51 = vmul.f32 0.5, %v851_v47 }
 0x2ee   : > { %v828_v52 = vmul.f32 0.5, %v827_v50 }
 0x2ef   : > { %v853_v54 = vsub.f32 1.5, %v852_v51 }
 0x2f0   : > { %v829_v56 = vsub.f32 1.5, %v828_v52 }
 0x2f1   : > { %v1521_v57 = vpop.eup %1520  ;;  %v854_v58 = vmul.f32 %v1517_v41, %v853_v54 }
 0x2f2   : > { %v428_v59 = vpop.permute.xlu1 %427  ;;  %v830_v60 = vmul.f32 %v1519_v42, %v829_v56  ;;  %v838_v61 = vmul.f32 %v1521_v57, %v811_v43 }
 0x2f3   : > { %v526_v63 = vadd.f32 %v1792_v55, %v428_v59  ;;  %v855_v1 = vmul.f32 %v854_v58, %v812_v29  ;;  %v970_v55 = vsel %vm667_vm6, %v908_v62, 0  ;;  %v997_v62 = vld [vmem:[%s1937_s3] sm:$0xf] }
 0x2f4   : > { %v831_v3 = vmul.f32 %v830_v60, %v810_v31  ;;  %v839_v5 = vmul.f32 %v1521_v57, %v838_v61 }
 0x2f5   : > { %v905_v6 = vpack.c.bf16 %v526_v63, %v526_v63  ;;  %v857_v7 = vsel %vm856_vm9, %v812_v29, %v855_v1  ;;  %v383_v29 = vld [vmem:[%s1936_s2 + $0x50] sm:$0xff]  ;;  %v1005_v63 = vsel %vm723_vm5, %v997_v62, 0  ;;  %v1000_v1 = vld [vmem:[%s1937_s3 + $0xc] sm:$0xf] }
 0x2f6   : > { %v860_v10 = vsel %vm858_vm10, %v859_v2, %v857_v7  ;;  %v833_v11 = vsel %vm832_vm11, %v810_v31, %v831_v3  ;;  %v840_v12 = vmul.f32 0.5, %v839_v5  ;;  %v1062_v2 = vsel %vm723_vm5, %v1000_v1, 0  ;;  %v999_v3 = vld [vmem:[%s1937_s3 + $0x8] sm:$0xf] }
 0x2f7   : > { %v913_v13 = vsel %vm667_vm6, %v905_v6, 0  ;;  %v864_v14 = vmul.f32 0.17677669, %v860_v10  ;;  %v836_v15 = vsel %vm834_vm12, %v835_v9, %v833_v11  ;;  %v1043_v5 = vsel %vm723_vm5, %v999_v3, 0  ;;  %v998_v11 = vld [vmem:[%s1937_s3 + $0x4] sm:$0xf] }
 0x2f8   : > { %922 = vmatpush.bf16.xpose.msrb.mxu2 %v913_v13  ;;  %v862_v16 = vmul.f32 0.17677669, %v836_v15  ;;  %v841_v17 = vsub.f32 1.5, %v840_v12  ;;  %v1024_v12 = vsel %vm723_vm5, %v998_v11, 0 }
 0x2f9   : > { %v874_v18 = vsel %vm667_vm6, %v864_v14, -inf }
 0x2fa   : > { %875 = vmax.xlane.f32.xlu2 %v874_v18  ;;  %v868_v19 = vsel %vm667_vm6, %v862_v16, -inf  ;;  %v842_v20 = vmul.f32 %v1521_v57, %v841_v17 }
 0x2fb   : > { %869 = vmax.xlane.f32.xlu0 %v868_v19 }
 0x2fc   : > { %v843_v21 = vmul.f32 %v842_v20, %v811_v43 }
 0x2fe   : > { %v845_v23 = vsel %vm844_vm13, %v811_v43, %v843_v21 }
 0x2ff   : > { %v848_v24 = vsel %vm846_vm14, %v847_v22, %v845_v23 }
 0x300   : > { %979 = vmatpush.bf16.xpose.msra.mxu2 %v970_v55  ;;  %v863_v25 = vmul.f32 0.17677669, %v848_v24 }
 0x302   : > { %v871_v26 = vsel %vm667_vm6, %v863_v25, -inf }
 0x303   : > { %872 = vmax.xlane.f32.xlu1 %v871_v26 }
 0x30f   : > { %432 = vperm.xlu0 %1506, %v382_v27  }
 0x312   : > { %437 = vperm.xlu2 %1505, %v383_v29  }
 0x355   : > { %v867_v31 = vpop.xlane.xlu2 %866 }
 0x356   : > { %v877_v32 = vsub.f32 %v1796_v28, %v867_v31 }
 0x358   : > { %v881_v33 = vmul.f32 1.442695, %v877_v32 }
 0x35a   : > { %1522 = vpow2.f32 %v881_v33 }
 0x360   : > { %v1523_v34 = vpop.eup %1522 }
 0x361   : > { %v889_v35 = vsel %vm667_vm6, %v1523_v34, 0.0  ;;  %v901_v36 = vpack.c.bf16 %v1523_v34, %v1523_v34 }
 0x362   : > { %890 = vadd.xlane.f32.xlu0 %v889_v35 }
 0x363   : > { %1392 = vmatmul.msk.bf16.vlgmr.msrb.gmra.mxu2 %vm667_vm6, %v901_v36 }
 0x364   : > { %1052 = vmatpush.bf16.msrb.mxu2 %v1043_v5 }
 0x36d   : > { %v876_v37 = vpop.xlane.xlu2 %875 }
 0x36e   : > { %v880_v38 = vsub.f32 %v864_v14, %v876_v37  ;;  %v870_v39 = vpop.xlane.xlu0 %869 }
 0x36f   : > { %v878_v41 = vsub.f32 %v862_v16, %v870_v39 }
 0x370   : > { %v887_v40 = vmul.f32 1.442695, %v880_v38 }
 0x371   : > { %v883_v42 = vmul.f32 1.442695, %v878_v41 }
 0x372   : > { %1524 = vpow2.f32 %v887_v40 }
 0x373   : > { %1526 = vpow2.f32 %v883_v42 }
 0x375   : > { %v438_v43 = vpop.permute.xlu2 %437 }
 0x376   : > { %v531_v44 = vadd.f32 %v1798_v30, %v438_v43  ;;  %v873_v28 = vpop.xlane.xlu1 %872 }
 0x377   : > { %v879_v45 = vsub.f32 %v863_v25, %v873_v28 }
 0x378   : > { %v1525_v46 = vpop.eup %1524  ;;  %v907_v47 = vpack.c.bf16 %v531_v44, %v531_v44 }
 0x379   : > { %v904_v48 = vpack.c.bf16 %v1525_v46, %v1525_v46  ;;  %v885_v49 = vmul.f32 1.442695, %v879_v45  ;;  %v898_v50 = vsel %vm667_vm6, %v1525_v46, 0.0  ;;  %v1527_v52 = vpop.eup %1526  ;;  %v1507_v46 = vld [vmem:[%s1938_s4] ss:$0 sm:$0xff] }
 0x37a   : > { %v951_v51 = vsel %vm667_vm6, %v907_v47, 0  ;;  %899 = vadd.xlane.f32.xlu1 %v898_v50  ;;  %v892_v30 = vsel %vm667_vm6, %v1527_v52, 0.0  ;;  %v902_v61 = vpack.c.bf16 %v1527_v52, %v1527_v52 }
 0x37b   : > { %1528 = vpow2.f32 %v885_v49  ;;  %960 = vmatpush.bf16.xpose.msra.mxu1 %v951_v51  ;;  %1395 = vmatmul.msk.bf16.vlgmr.msra.gmra.mxu2 %vm667_vm6, %v904_v48 }
 0x381   : > { %v1529_v53 = vpop.eup %1528  ;;  %v433_v54 = vpop.permute.xlu0 %432 }
 0x382   : > { %v903_v56 = vpack.c.bf16 %v1529_v53, %v1529_v53  ;;  %v528_v57 = vadd.f32 %v1794_v4, %v433_v54  ;;  %893 = vadd.xlane.f32.xlu1 %v892_v30  ;;  %v895_v58 = vsel %vm667_vm6, %v1529_v53, 0.0 }
 0x383   : > { %896 = vadd.xlane.f32.xlu2 %v895_v58  ;;  %1033 = vmatpush.bf16.msrb.mxu1 %v1024_v12 }
 0x384   : > { %v906_v59 = vpack.c.bf16 %v528_v57, %v528_v57  ;;  %1394 = vmatmul.msk.bf16.vlgmr.msra.gmra.mxu1 %vm667_vm6, %v903_v56  ;;  %v1453_v56 = vld [vmem:[%s1939_s5 + $0x8] sm:$0xff] }
 0x386   : > { %v932_v60 = vsel %vm667_vm6, %v906_v59, 0 }
 0x387   : > { %941 = vmatpush.bf16.xpose.msrb.mxu3 %v932_v60  ;;  %1142 = vmatpush.bf16.msra.mxu1 %v1453_v56 }
 0x38e   : > { %1393 = vmatmul.msk.bf16.vlgmr.msrb.gmra.mxu3 %vm667_vm6, %v902_v61 }
 0x38f   : > { %1014 = vmatpush.bf16.msra.mxu3 %v1005_v63 }
 0x393   : > { %1071 = vmatpush.bf16.msrb.mxu3 %v1062_v2 }
 0x3d5   : > { %v891_v4 = vpop.xlane.xlu0 %890 }
 0x3d6   : > { %1530 = vrcp.f32 %v891_v4 }
 0x3dc   : > { %v1531_v6 = vpop.eup %1530 }
 0x3e6   : > { %v924_v7 = vpop.f32.mrf.mxu2 }
 0x3e7   : > { %v989_v9 = vmul.f32 %v1531_v6, %v924_v7  ;;  %v1460_v6 = vld [vmem:[%s1941_s7 + $0x30] sm:$0xff]  ;;  %v1508_v7 = vld [vmem:[%s1940_s6] ss:$0 sm:$0xff] }
 0x3e9   : > { %v993_v10 = vpack.c.bf16 %v989_v9, %v989_v9 }
 0x3eb   : > { %1396 = vmatmul.msk.bf16.vlgmr.msra.gmra.mxu3 %vm667_vm6, %v993_v10  ;;  %v1459_v10 = vld [vmem:[%s1941_s7 + $0x28] sm:$0xff] }
 0x3ed   : > { %v900_v14 = vpop.xlane.xlu1 %899 }
 0x3ee   : > { %v926_v13 = vpop.f32.mrf.mxu2  ;;  %1532 = vrcp.f32 %v900_v14 }
 0x3ef   : > { %v1458_v13 = vld [vmem:[%s1941_s7 + $0x20] sm:$0xff] }
 0x3f4   : > { %v1533_v55 = vpop.eup %1532 }
 0x3f5   : > { %v894_v24 = vpop.xlane.xlu1 %893 }
 0x3f6   : > { %v897_v15 = vpop.xlane.xlu2 %896 }
 0x3f7   : > { %1534 = vrcp.f32 %v897_v15 }
 0x3f8   : > { %1536 = vrcp.f32 %v894_v24 }
 0x3fd   : > { %v1535_v18 = vpop.eup %1534 }
 0x3fe   : > { %v981_v16 = vpop.f32.mrf.mxu2  ;;  %v1537_v26 = vpop.eup %1536 }
 0x3ff   : > { %v992_v17 = vmul.f32 %v1533_v55, %v981_v16  ;;  %v1457_v16 = vld [vmem:[%s1941_s7 + $0x18] sm:$0xff] }
 0x401   : > { %v996_v19 = vpack.c.bf16 %v992_v17, %v992_v17  ;;  %v962_v20 = vpop.f32.mrf.mxu1 }
 0x402   : > { %v991_v21 = vmul.f32 %v1535_v18, %v962_v20 }
 0x403   : > { %1399 = vmatmul.msk.bf16.vlgmr.msrb.gmra.mxu3 %vm667_vm6, %v996_v19 }
 0x404   : > { %v995_v22 = vpack.c.bf16 %v991_v21, %v991_v21  ;;  %v1456_v21 = vld [vmem:[%s1941_s7 + $0x10] sm:$0xff] }
 0x406   : > { %v983_v23 = vpop.f32.mrf.mxu2  ;;  %1398 = vmatmul.msk.bf16.vlgmr.msrb.gmra.mxu2 %vm667_vm6, %v995_v22 }
 0x409   : > { %v964_v25 = vpop.f32.mrf.mxu1 }
 0x411   : > { %v943_v27 = vpop.f32.mrf.mxu3 }
 0x412   : > { %v990_v29 = vmul.f32 %v1537_v26, %v943_v27  ;;  %v1455_v26 = vld [vmem:[%s1941_s7 + $0x8] sm:$0xff] }
 0x414   : > { %v994_v31 = vpack.c.bf16 %v990_v29, %v990_v29 }
 0x416   : > { %1397 = vmatmul.msk.bf16.vlgmr.msrb.gmra.mxu1 %vm667_vm6, %v994_v31 }
 0x419   : > { %v945_v32 = vpop.f32.mrf.mxu3 }
 0x41a   : > { %v1454_v32 = vld [vmem:[%s1941_s7] sm:$0xff] }
 0x46e   : > { %v1016_v33 = vpop.f32.mrf.mxu3 }
 0x46f   : > { %v1077_v40 = vsel %vm330_vm0, %v1016_v33, 0.0 }
 0x476   : > { %v1018_v34 = vpop.f32.mrf.mxu3 }
 0x486   : > { %v1073_v35 = vpop.f32.mrf.mxu3 }
 0x487   : > { %v1082_v28 = vsel %vm330_vm0, %v1073_v35, 0.0 }
 0x489   : > { %v1054_v36 = vpop.f32.mrf.mxu2 }
 0x48a   : > { %v1080_v43 = vsel %vm330_vm0, %v1054_v36, 0.0 }
 0x48e   : > { %v1075_v37 = vpop.f32.mrf.mxu3 }
 0x491   : > { %v1056_v38 = vpop.f32.mrf.mxu2 }
 0x493   : > { %v1035_v39 = vpop.f32.mrf.mxu1 }
 0x494   : > { %v1078_v41 = vsel %vm330_vm0, %v1035_v39, 0.0 }
 0x495   : > { %v1079_v42 = vadd.f32 %v1078_v41, %v1077_v40 }
 0x497   : > { %v1081_v44 = vadd.f32 %v1080_v43, %v1079_v42 }
 0x499   : > { %v1083_v45 = vadd.f32 %v1082_v28, %v1081_v44 }
 0x49b   : > { %v1037_v47 = vpop.f32.mrf.mxu1  ;;  %v1084_v48 = vadd.f32 %v1083_v45, %v1711_v0  ;;  %v1452_v0 = vld [vmem:[%s1939_s5] sm:$0xff] }
 0x49c   : > { %1143 = vmatpush.bf16.msra.mxu1 %v1452_v0 }
 0x49d   : > { %v1855_v49 = vadd.f32 %v1507_v46, %v1084_v48 }
 0x49f   : > { %v1090_v50 = vsel %vm330_vm0, %v1855_v49, 0.0 }
 0x4a0   : > { %1091 = vadd.xlane.f32.xlu1 %v1090_v50 }
 0x513   : > { %v1092_v51 = vpop.xlane.xlu1 %1091 }
 0x514   : > { %v1093_v52 = vmul.f32 %v1092_v51, %v1715_v8 }
 0x516   : > { %v1094_v53 = vsub.f32 %v1855_v49, %v1093_v52 }
 0x518   : > { %v1095_v54 = vmul.f32 %v1094_v53, %v1094_v53 }
 0x51a   : > { %v1096_v30 = vsel %vm330_vm0, %v1095_v54, 0.0 }
 0x51b   : > { %1097 = vadd.xlane.f32.xlu2 %v1096_v30 }
 0x58e   : > { %v1098_v57 = vpop.xlane.xlu2 %1097 }
 0x58f   : > { %v1099_v58 = vmul.f32 %v1098_v57, %v1715_v8  ;;  %v1461_v8 = vld [vmem:[%s1941_s7 + $0x38] sm:$0xff] }
 0x590   : > { %1262 = vmatpush.bf16.msra.mxu2 %v1461_v8 }
 0x591   : > { %v1100_v59 = vadd.f32 1e-05, %v1099_v58  ;;  %v1509_v58 = vld [vmem:[%s1942_s8] ss:$0 sm:$0xff] }
 0x593   : > { %1538 = vrsqrt.f32 %v1100_v59  ;;  %vm1107_vm1 = vweird.f32 %v1100_v59 }
 0x594   : > { %1263 = vmatpush.bf16.msra.mxu2 %v1460_v6 }
 0x598   : > { %1264 = vmatpush.bf16.msra.mxu2 %v1459_v10 }
 0x599   : > { %v1539_v60 = vpop.eup %1538 }
 0x59a   : > { %v1102_v61 = vmul.f32 %v1539_v60, %v1100_v59  ;;  %vm1108_vm15 = vweird.f32 %v1539_v60 }
 0x59b   : > { %vm1109_vm2 = vmor %vm1107_vm1, %vm1108_vm15 }
 0x59c   : > { %v1103_v62 = vmul.f32 %v1539_v60, %v1102_v61  ;;  %1265 = vmatpush.bf16.msra.mxu2 %v1458_v13 }
 0x59e   : > { %v1104_v63 = vmul.f32 0.5, %v1103_v62 }
 0x5a0   : > { %v1105_v4 = vsub.f32 1.5, %v1104_v63  ;;  %1266 = vmatpush.bf16.msra.mxu2 %v1457_v16 }
 0x5a2   : > { %v1106_v1 = vmul.f32 %v1539_v60, %v1105_v4 }
 0x5a4   : > { %v1110_v2 = vsel %vm1109_vm2, %v1539_v60, %v1106_v1  ;;  %1267 = vmatpush.bf16.msra.mxu2 %v1456_v21 }
 0x5a5   : > { %v1111_v3 = vmul.f32 %v1110_v2, %v1094_v53 }
 0x5a7   : > { %v1112_v5 = vpack.c.bf16 %v1111_v3, %v1111_v3 }
 0x5a8   : > { %1268 = vmatpush.bf16.msra.mxu2 %v1455_v26 }
 0x5a9   : > { %1408 = vmatmul.msk.bf16.vlgmr.msra.gmra.mxu1 %vm330_vm0, %v1112_v5 }
 0x5ac   : > { %1269 = vmatpush.bf16.msra.mxu2 %v1454_v32 }
 0x626   : > { %v1145_v9 = vpop.f32.mrf.mxu1 }
 0x627   : > { %v1146_v11 = vadd.f32 %v1508_v7, %v1145_v9 }
 0x629   : > { %v1150_v12 = vmul.f32 0.70710677, %v1146_v11  ;;  %v1149_v30 = vmul.f32 0.5, %v1146_v11 }
 0x62b   : > { %v1151_v14 = vmul.f32 %v1150_v12, %v1150_v12 }
 0x62d   : > { %v1152_v15 = vmin.f32 %v1151_v14, 16.0 }
 0x62e   : > { %v1147_v55 = vpop.f32.mrf.mxu1 }
 0x62f   : > { %v1153_v17 = vmul.f32 2.1237322e-06, %v1152_v15  ;;  %v1164_v18 = vmul.f32 3.8918573e-05, %v1152_v15 }
 0x631   : > { %v1154_v19 = vadd.f32 0.00028619796, %v1153_v17  ;;  %v1165_v20 = vadd.f32 0.001143296, %v1164_v18 }
 0x633   : > { %v1155_v22 = vmul.f32 %v1154_v19, %v1152_v15  ;;  %v1166_v23 = vmul.f32 %v1165_v20, %v1152_v15 }
 0x635   : > { %v1167_v24 = vadd.f32 0.014752088, %v1166_v23  ;;  %v1156_v25 = vadd.f32 0.0036580483, %v1155_v22 }
 0x637   : > { %v1168_v27 = vmul.f32 %v1167_v24, %v1152_v15  ;;  %v1157_v31 = vmul.f32 %v1156_v25, %v1152_v15 }
 0x639   : > { %v1169_v29 = vadd.f32 0.112945676, %v1168_v27  ;;  %v1158_v35 = vadd.f32 0.05243302, %v1157_v31 }
 0x63b   : > { %v1170_v33 = vmul.f32 %v1169_v29, %v1152_v15  ;;  %v1159_v38 = vmul.f32 %v1158_v35, %v1152_v15 }
 0x63d   : > { %v1171_v34 = vadd.f32 0.4994258, %v1170_v33  ;;  %v1160_v39 = vadd.f32 0.18741608, %v1159_v38 }
 0x63f   : > { %v1172_v36 = vmul.f32 %v1171_v34, %v1152_v15  ;;  %v1161_v41 = vmul.f32 %v1160_v39, %v1152_v15 }
 0x641   : > { %v1173_v37 = vadd.f32 1.0, %v1172_v36  ;;  %v1162_v28 = vadd.f32 1.1283791, %v1161_v41 }
 0x643   : > { %1540 = vrcp.f32 %v1173_v37  ;;  %v1185_v44 = vand.u32 2147483648, %v1173_v37  ;;  %v1183_v46 = vand.u32 2147483647, %v1173_v37  ;;  %vm1179_vm4 = vweird.f32 %v1173_v37 }
 0x644   : > { %v1163_v50 = vmul.f32 %v1162_v28, %v1150_v12 }
 0x645   : > { %v1186_v48 = vor.u32 1.1754944e-38, %v1185_v44  ;;  %vm1184_vm6 = vcmp.eq.f32.partialorder %v1183_v46, 8.507059e+37 }
 0x649   : > { %v1541_v40 = vpop.eup %1540 }
 0x64a   : > { %v1175_v42 = vmul.f32 %v1541_v40, %v1173_v37  ;;  %vm1180_vm3 = vweird.f32 %v1541_v40 }
 0x64b   : > { %vm1181_vm5 = vmor %vm1179_vm4, %vm1180_vm3 }
 0x64c   : > { %v1176_v43 = vsub.f32 1.0, %v1175_v42 }
 0x64e   : > { %v1177_v45 = vmul.f32 %v1541_v40, %v1176_v43 }
 0x650   : > { %v1178_v47 = vadd.f32 %v1541_v40, %v1177_v45 }
 0x652   : > { %v1182_v51 = vsel %vm1181_vm5, %v1541_v40, %v1178_v47 }
 0x653   : > { %v1187_v52 = vsel %vm1184_vm6, %v1186_v48, %v1182_v51 }
 0x654   : > { %v1188_v53 = vmul.f32 %v1187_v52, %v1163_v50 }
 0x656   : > { %v1409_v54 = vclamps-f32 %v1188_v53, 1.0 }
 0x658   : > { %v1191_v56 = vadd.f32 1.0, %v1409_v54 }
 0x65a   : > { %v1192_v0 = vmul.f32 %v1191_v56, %v1149_v30 }
 0x65c   : > { %v1193_v57 = vpack.c.bf16 %v1192_v0, %v1192_v0 }
 0x65e   : > { %1270 = vmatmul.bf16.vlgmr.msra.gmra.mxu2 %v1193_v57 }
 0x6e1   : > { %v1271_v59 = vpop.f32.mrf.mxu2 }
 0x6e2   : > { %v1272_v60 = vadd.f32 %v1509_v58, %v1271_v59 }
 0x6e4   : > { %v1275_v61 = vadd.f32 %v1272_v60, %v1855_v49 }
 0x6e6   : > { %1276 = vst.msk [vmem:[%s323_s14] sm:$0xff] %vm330_vm0, %v1275_v61 }
 0x6e7   : > { %1569 = shalt.err (!%p1566_p3)
}
 0x6e8   : > { %1462 = dma.vmem_to_hbm [thread:$0]  (%p1696_p5), %s1291_s16, 128, %s1293_s17, %s1278_s13  }
 0x6e9   : > { %v1273_v49 = vpop.f32.mrf.mxu2 }
 0x6ea PF: > { %p1468_p4 = scmp.ge.s32.totalorder %s1604_s12, 2  ;;  %s1304_s22 = sand.u32 1, %s1592_s30  }
 0x6eb   : > { %s1305_s29 = scalar_lea.sflag [#allocation3], %s1304_s22 }
 0x6ec   : > { %p1465_p7 = pnand %p1468_p4, %p1700_p6 }
 0x6ee   : > { %p1466_p8 = pneg %p1465_p7 }
 0x6f0   : > { %1587 = dma.done.wait (%p1466_p8), %s1305_s29, 128  }
 0x6f1   : > { %1589 = vsyncadd (%p1466_p8), %s1305_s29, 4294967168  ;;  %p19_p9 = scmp.ge.s32.totalorder %s1683_s15, 4   ;;  %s1946_s30 = smov %s1596_s10 }
 0x6f2   : > { %s1947_s10 = smov %s1600_s11  ;;  %s1948_s11 = smov %s1694_s18 }
 0x6f3   : > { %s1949_s12 = smov %s1683_s15  ;;  %21 = sbr.rel (!%p19_p9) target bundleno = 3 (0x3), region = 91 }
 0x6f8   :  { %1311 = vsyncpa [#allocation3], 1 }
 0x6f9   :  { %1313 = vsyncpa [#allocation3 + $0x1], 1 }

</bundles_post_ra>
